<compile_context>
chip_gen: v6e
topology: v6e:2x2x1
jax: 0.10.0
libtpu: 0.0.40
codegen_flags: <defaults>
</compile_context>

<pallas_src>
import functools

import jax
import jax.numpy as jnp
from jax.experimental import pallas as pl
from jax.experimental.pallas import tpu as pltpu


def _compute_dtype():
    """bf16 hidden-layer compute on chips with bf16 VPU/EUP (v6e/v7x), else f32."""
    try:
        kind = jax.devices()[0].device_kind.lower()
    except Exception:
        return jnp.float32
    if ("v6" in kind) or ("v7" in kind) or ("7x" in kind):
        return jnp.bfloat16
    return jnp.float32  # v5e etc.: bf16 would only add converts, no EUP speedup


def mlp_kernel(x_ref, w1_ref, b1_ref, w2_ref, b2_ref, w3_ref, b3_ref, o_ref,
               *, compute_dtype):
    x = x_ref[...]                      # [3, TB]  (batch on lanes), f32
    w1 = w1_ref[...]                    # [N, 3]   f32

    # Layer 1 (in=3): K=3 contraction as 3 broadcast-FMAs (outer products) on
    # the VPU instead of a 97%-padded MXU matmul.
    # TODO(synk): switch to stride-0 sublane-broadcast loads
    # (x_ref[pl.ds(k, N, stride=0), :]) once stride-0 slices are guaranteed.
    h1 = (w1[:, 0:1] * x[0:1, :]
          + w1[:, 1:2] * x[1:2, :]
          + w1[:, 2:3] * x[2:3, :]
          + b1_ref[...])                                               # [N, TB] f32
    h1 = jnp.tanh(h1.astype(compute_dtype))                            # EUP (bf16 on v6e/v7x)

    # Layer 2 (N x N): the only real MXU work. bf16 x bf16 inputs where
    # available (w2 is pre-cast in the wrapper), always f32 accumulation.
    h2 = jnp.dot(w2_ref[...], h1,
                 preferred_element_type=jnp.float32) + b2_ref[...]     # [N, TB] f32
    h2 = jnp.tanh(h2.astype(compute_dtype))

    # Layer 3 (out=1): elementwise multiply + sublane reduce (XLU), in f32.
    h3 = jnp.sum(w3_ref[...] * h2.astype(jnp.float32),
                 axis=0, keepdims=True) + b3_ref[...]                   # [1, TB] f32

    o_ref[...] = h3.astype(o_ref.dtype)


def neural_network_forward(x, params, tile_b=None):
    """x: [B, 3] float32 -> [B, 1] float32."""
    w1, b1, w2, b2, w3, b3 = params
    B, F = x.shape
    N = w1.shape[0]

    compute_dtype = _compute_dtype()

    # Big batch tiles to amortize the ~0.35us/grid-step overhead.
    # 8K-16K keeps the per-step footprint at a few MiB (well under scoped
    # VMEM even on v5e, where activations stay f32).
    if tile_b is None:
        tile_b = 8192 if compute_dtype == jnp.float32 else 16384
    tile_b = max(128, ((int(tile_b) + 127) // 128) * 128)   # lane-aligned tile

    # Batch onto the lane axis.  A single wrapper-side transpose pass remains.
    # TODO(synk): load (TB, 3) blocks of the untransposed x and transpose the
    # small slab in-kernel once Mosaic relayout of [TB,3] transposes is solid.
    x_t = x.T                                                # [3, B]

    # Pad only when the batch is not lane-aligned (cheap / rare); ragged last
    # grid tiles are handled by Pallas masked stores, so no TB-granular pad.
    Bp = pl.cdiv(B, 128) * 128
    if Bp != B:
        x_t = jnp.pad(x_t, ((0, 0), (0, Bp - B)))

    TB = min(tile_b, Bp)
    if Bp >= 2 * 128:
        # Keep at least 2 grid steps so both TensorCores get work on v7x.
        TB = min(TB, pl.cdiv(pl.cdiv(Bp, 2), 128) * 128)
    grid = pl.cdiv(Bp, TB)

    # Pre-cast w2 so the MXU sees matching (bf16 x bf16 or f32 x f32) inputs;
    # it is VMEM-resident, so this is a one-time cast.
    w2c = w2.astype(compute_dtype)

    const = lambda i: (0, 0)                                 # resident weights
    out_t = pl.pallas_call(
        functools.partial(mlp_kernel, compute_dtype=compute_dtype),
        out_shape=jax.ShapeDtypeStruct((1, Bp), x.dtype),
        grid=(grid,),
        in_specs=[
            pl.BlockSpec((F, TB), lambda i: (0, i)),          # x tile [3, TB]
            pl.BlockSpec((N, F), const),                      # w1  [N, 3]
            pl.BlockSpec((N, 1), const),                      # b1  [N, 1]
            pl.BlockSpec((N, N), const),                      # w2  [N, N]
            pl.BlockSpec((N, 1), const),                      # b2  [N, 1]
            pl.BlockSpec((N, 1), const),                      # w3  [N, 1] (column)
            pl.BlockSpec((1, 1), const),                      # b3  [1, 1]
        ],
        out_specs=pl.BlockSpec((1, TB), lambda i: (0, i)),
        compiler_params=pltpu.CompilerParams(
            dimension_semantics=("parallel",),                # shards across TCs
            vmem_limit_bytes=32 * 1024 * 1024),               # safe on v5e/v6e/v7x
    )(x_t, w1, b1, w2c, b2, w3, b3)

    return out_t[:, :B].reshape(B, 1)                         # [B, 1]


def init_params(key, neurons):
    """Mirror nn.Linear init: U(-1/sqrt(fan_in), +1/sqrt(fan_in)).

    Weights in PyTorch [out, in] layout (what the batch-on-lanes kernel wants
    on the LHS); biases as [out, 1] columns; the final weight stored as an
    [neurons, 1] column for the multiply+reduce formulation.
    """
    k1, k2, k3, k4, k5, k6 = jax.random.split(key, 6)

    def linear(kw, kb, fan_in, fan_out):
        bound = 1.0 / jnp.sqrt(jnp.float32(fan_in))
        w = jax.random.uniform(kw, (fan_out, fan_in), jnp.float32, -bound, bound)
        b = jax.random.uniform(kb, (fan_out, 1), jnp.float32, -bound, bound)
        return w, b

    w1, b1 = linear(k1, k2, 3, neurons)          # [N,3], [N,1]
    w2, b2 = linear(k3, k4, neurons, neurons)    # [N,N], [N,1]
    w3, b3 = linear(k5, k6, neurons, 1)          # [1,N], [1,1]
    return (w1, b1, w2, b2, w3.T, b3)            # w3 stored as [N,1] column


def reference_forward(x, params):
    w1, b1, w2, b2, w3c, b3 = params
    h = jnp.tanh(x @ w1.T + b1.T)
    h = jnp.tanh(h @ w2.T + b2.T)
    return h @ w3c + b3


if __name__ == "__main__":
    neurons = 32
    key = jax.random.PRNGKey(0)
    kx, kp, kx2 = jax.random.split(key, 3)
    params = init_params(kp, neurons)

    # Tolerance depends on whether the bf16 hidden-layer path is active.
    bf16 = _compute_dtype() == jnp.bfloat16
    tol = dict(atol=5e-2, rtol=5e-2) if bf16 else dict(atol=1e-5, rtol=1e-5)

    # Small batch: pads to one 128-lane tile, grid of 1.
    x_small = jax.random.normal(kx, (8, 3), dtype=jnp.float32)
    out_small = jax.block_until_ready(neural_network_forward(x_small, params))
    assert out_small.shape == (8, 1), out_small.shape
    assert jnp.allclose(out_small, reference_forward(x_small, params), **tol), \
        "small-batch mismatch"

    # Larger batch: multi-step parallel grid (>=2 steps for v7x), resident
    # weights, and a ragged (masked) final tile — no wrapper-side pad.
    x_big = jax.random.normal(kx2, (384, 3), dtype=jnp.float32)
    out_big = jax.block_until_ready(neural_network_forward(x_big, params))
    assert out_big.shape == (384, 1), out_big.shape
    assert jnp.allclose(out_big, reference_forward(x_big, params), **tol), \
        "large-batch mismatch"

    print("KERNEL_OK")
</pallas_src>

<mosaic_0001>
module attributes {stable_mosaic.version = 11 : i64} {
  func.func @mlp_kernel(%arg0: i32, %arg1: memref<3x128xf32, #tpu.memory_space<vmem>>, %arg2: memref<32x3xf32, #tpu.memory_space<vmem>>, %arg3: memref<32x1xf32, #tpu.memory_space<vmem>>, %arg4: memref<32x32xf32, #tpu.memory_space<vmem>>, %arg5: memref<32x1xf32, #tpu.memory_space<vmem>>, %arg6: memref<32x1xf32, #tpu.memory_space<vmem>>, %arg7: memref<1x1xf32, #tpu.memory_space<vmem>>, %arg8: memref<1x128xf32, #tpu.memory_space<vmem>>) attributes {dimension_semantics = [#tpu.dimension_semantics<parallel>], iteration_bounds = array<i64: 1>, scalar_prefetch = 0 : i64, scratch_operands = 0 : i64, tpu.core_type = #tpu.core_type<tc>, window_params = [{transform_indices = @transform_0, window_bounds = array<i64: 3, 128>}, {pipeline_mode = #tpu.pipeline_mode<synchronous>, transform_indices = @transform_1, window_bounds = array<i64: 32, 3>}, {pipeline_mode = #tpu.pipeline_mode<synchronous>, transform_indices = @transform_2, window_bounds = array<i64: 32, 1>}, {pipeline_mode = #tpu.pipeline_mode<synchronous>, transform_indices = @transform_3, window_bounds = array<i64: 32, 32>}, {pipeline_mode = #tpu.pipeline_mode<synchronous>, transform_indices = @transform_4, window_bounds = array<i64: 32, 1>}, {pipeline_mode = #tpu.pipeline_mode<synchronous>, transform_indices = @transform_5, window_bounds = array<i64: 32, 1>}, {pipeline_mode = #tpu.pipeline_mode<synchronous>, transform_indices = @transform_6, window_bounds = array<i64: 1, 1>}, {transform_indices = @transform_7, window_bounds = array<i64: 1, 128>}]} {
    %c0 = arith.constant 0 : index
    %c0_0 = arith.constant 0 : index
    %0 = vector.load %arg1[%c0, %c0_0] : memref<3x128xf32, #tpu.memory_space<vmem>>, vector<3x128xf32>
    %c0_1 = arith.constant 0 : index
    %c0_2 = arith.constant 0 : index
    %1 = vector.load %arg2[%c0_1, %c0_2] : memref<32x3xf32, #tpu.memory_space<vmem>>, vector<32x3xf32>
    %2 = vector.extract_strided_slice %1 {offsets = [0, 0], sizes = [32, 1], strides = [1, 1]} : vector<32x3xf32> to vector<32x1xf32>
    %3 = vector.extract_strided_slice %0 {offsets = [0, 0], sizes = [1, 128], strides = [1, 1]} : vector<3x128xf32> to vector<1x128xf32>
    %4 = vector.broadcast %2 : vector<32x1xf32> to vector<32x128xf32>
    %5 = vector.broadcast %3 : vector<1x128xf32> to vector<32x128xf32>
    %6 = arith.mulf %4, %5 : vector<32x128xf32>
    %7 = vector.extract_strided_slice %1 {offsets = [0, 1], sizes = [32, 1], strides = [1, 1]} : vector<32x3xf32> to vector<32x1xf32>
    %8 = vector.extract_strided_slice %0 {offsets = [1, 0], sizes = [1, 128], strides = [1, 1]} : vector<3x128xf32> to vector<1x128xf32>
    %9 = vector.broadcast %7 : vector<32x1xf32> to vector<32x128xf32>
    %10 = vector.broadcast %8 : vector<1x128xf32> to vector<32x128xf32>
    %11 = arith.mulf %9, %10 : vector<32x128xf32>
    %12 = arith.addf %6, %11 : vector<32x128xf32>
    %13 = vector.extract_strided_slice %1 {offsets = [0, 2], sizes = [32, 1], strides = [1, 1]} : vector<32x3xf32> to vector<32x1xf32>
    %14 = vector.extract_strided_slice %0 {offsets = [2, 0], sizes = [1, 128], strides = [1, 1]} : vector<3x128xf32> to vector<1x128xf32>
    %15 = vector.broadcast %13 : vector<32x1xf32> to vector<32x128xf32>
    %16 = vector.broadcast %14 : vector<1x128xf32> to vector<32x128xf32>
    %17 = arith.mulf %15, %16 : vector<32x128xf32>
    %18 = arith.addf %12, %17 : vector<32x128xf32>
    %c0_3 = arith.constant 0 : index
    %c0_4 = arith.constant 0 : index
    %19 = vector.load %arg3[%c0_3, %c0_4] : memref<32x1xf32, #tpu.memory_space<vmem>>, vector<32x1xf32>
    %20 = vector.broadcast %19 : vector<32x1xf32> to vector<32x128xf32>
    %21 = arith.addf %18, %20 : vector<32x128xf32>
    %22 = math.tanh %21 : vector<32x128xf32>
    %c0_5 = arith.constant 0 : index
    %c0_6 = arith.constant 0 : index
    %23 = vector.load %arg4[%c0_5, %c0_6] : memref<32x32xf32, #tpu.memory_space<vmem>>, vector<32x32xf32>
    %cst = arith.constant dense<0.000000e+00> : vector<32x128xf32>
    %24 = tpu.matmul %23, %22, %cst {dimension_numbers = #tpu.dot_dimension_numbers<[1], [0], [0], [1], [0, 0, 1, 1], [], []>} : vector<32x32xf32>, vector<32x128xf32>, vector<32x128xf32> -> vector<32x128xf32>
    %c0_7 = arith.constant 0 : index
    %c0_8 = arith.constant 0 : index
    %25 = vector.load %arg5[%c0_7, %c0_8] : memref<32x1xf32, #tpu.memory_space<vmem>>, vector<32x1xf32>
    %26 = vector.broadcast %25 : vector<32x1xf32> to vector<32x128xf32>
    %27 = arith.addf %24, %26 : vector<32x128xf32>
    %28 = math.tanh %27 : vector<32x128xf32>
    %c0_9 = arith.constant 0 : index
    %c0_10 = arith.constant 0 : index
    %29 = vector.load %arg6[%c0_9, %c0_10] : memref<32x1xf32, #tpu.memory_space<vmem>>, vector<32x1xf32>
    %30 = vector.broadcast %29 : vector<32x1xf32> to vector<32x128xf32>
    %31 = arith.mulf %30, %28 : vector<32x128xf32>
    %cst_11 = arith.constant dense<0.000000e+00> : vector<128xf32>
    %32 = vector.multi_reduction <add>, %31, %cst_11 [0] : vector<32x128xf32> to vector<128xf32>
    %33 = vector.shape_cast %32 : vector<128xf32> to vector<1x128xf32>
    %c0_12 = arith.constant 0 : index
    %c0_13 = arith.constant 0 : index
    %34 = vector.load %arg7[%c0_12, %c0_13] : memref<1x1xf32, #tpu.memory_space<vmem>>, vector<1x1xf32>
    %35 = vector.broadcast %34 : vector<1x1xf32> to vector<1x128xf32>
    %36 = arith.addf %33, %35 : vector<1x128xf32>
    %c0_14 = arith.constant 0 : index
    %c0_15 = arith.constant 0 : index
    %37 = vector.load %arg8[%c0_14, %c0_15] : memref<1x128xf32, #tpu.memory_space<vmem>>, vector<1x128xf32>
    tpu.vector_store %arg8[%c0_14, %c0_15], %36 {strides = array<i32>} : memref<1x128xf32, #tpu.memory_space<vmem>>, vector<1x128xf32>,
    return
  }
  func.func @transform_0(%arg0: i32) -> (i32, i32) {
    %c0_i32 = arith.constant 0 : i32
    %c0_i32_0 = arith.constant 0 : i32
    return %c0_i32, %arg0 : i32, i32
  }
  func.func @transform_1(%arg0: i32) -> (i32, i32) {
    %c0_i32 = arith.constant 0 : i32
    %c0_i32_0 = arith.constant 0 : i32
    %c0_i32_1 = arith.constant 0 : i32
    return %c0_i32, %c0_i32_0 : i32, i32
  }
  func.func @transform_2(%arg0: i32) -> (i32, i32) {
    %c0_i32 = arith.constant 0 : i32
    %c0_i32_0 = arith.constant 0 : i32
    %c0_i32_1 = arith.constant 0 : i32
    return %c0_i32, %c0_i32_0 : i32, i32
  }
  func.func @transform_3(%arg0: i32) -> (i32, i32) {
    %c0_i32 = arith.constant 0 : i32
    %c0_i32_0 = arith.constant 0 : i32
    %c0_i32_1 = arith.constant 0 : i32
    return %c0_i32, %c0_i32_0 : i32, i32
  }
  func.func @transform_4(%arg0: i32) -> (i32, i32) {
    %c0_i32 = arith.constant 0 : i32
    %c0_i32_0 = arith.constant 0 : i32
    %c0_i32_1 = arith.constant 0 : i32
    return %c0_i32, %c0_i32_0 : i32, i32
  }
  func.func @transform_5(%arg0: i32) -> (i32, i32) {
    %c0_i32 = arith.constant 0 : i32
    %c0_i32_0 = arith.constant 0 : i32
    %c0_i32_1 = arith.constant 0 : i32
    return %c0_i32, %c0_i32_0 : i32, i32
  }
  func.func @transform_6(%arg0: i32) -> (i32, i32) {
    %c0_i32 = arith.constant 0 : i32
    %c0_i32_0 = arith.constant 0 : i32
    %c0_i32_1 = arith.constant 0 : i32
    return %c0_i32, %c0_i32_0 : i32, i32
  }
  func.func @transform_7(%arg0: i32) -> (i32, i32) {
    %c0_i32 = arith.constant 0 : i32
    %c0_i32_0 = arith.constant 0 : i32
    return %c0_i32, %arg0 : i32, i32
  }
}

</mosaic_0001>

<bundles_post_ra>
// kernel: tpu_custom_call.1
= control target key start
LH: loop header
LB: loop body
LE: loop exit
PB: predicated region body
PF: predicated region fallthrough
CT: control target
= control target key end

     0   :  { %s557_s0 = inlined_call_operand.vmem [shape: f32[3,128], index: 0, kind: input, shape index: {}]   ;;  %s558_s1 = inlined_call_operand.vmem [shape: f32[32,3], index: 1, kind: input, shape index: {}]   ;;  %s559_s2 = inlined_call_operand.vmem [shape: f32[32,1], index: 2, kind: input, shape index: {}]   ;;  %s560_s3 = inlined_call_operand.vmem [shape: f32[32,32], index: 3, kind: input, shape index: {}]   ;;  %s561_s4 = inlined_call_operand.vmem [shape: f32[32,1], index: 4, kind: input, shape index: {}]   ;;  %s562_s5 = inlined_call_operand.vmem [shape: f32[32,1], index: 5, kind: input, shape index: {}]   ;;  %s563_s6 = inlined_call_operand.<no memory space> [shape: f32[1,1], index: 6, kind: input, shape index: {}]   ;;  %s564_s7 = inlined_call_operand.hbm [shape: f32[1,128], index: 7, kind: output, shape index: {}]  }
   0x1   :  { %v12_v0 = vstv %s563_s6 }
   0x2   :  { %13 = vst [vmem:[#allocation2] sm:$0x1] %v12_v0 }
   0x3   :  { %v33_v1 = vld [vmem:[%s558_s1 + $0x18] sm:$0xff]  ;;  %v32_v2 = vld [vmem:[%s558_s1 + $0x10] sm:$0xff]  ;;  %v431_v3 = vmov 1   ;;  %v432_v4 = vmov 0   ;;  %v31_v5 = vld [vmem:[%s558_s1 + $0x8] sm:$0xff]  ;;  %v433_v6 = vmov 2  }
   0x4   :  { %381 = vset.pattern.permute.xlu0 %v431_v3  ;;  %382 = vset.pattern.permute.xlu1 %v432_v4 }
   0x5   :  { %75 = vperm.xlu0 %381, %v33_v1   ;;  %46 = vperm.xlu1 %382, %v32_v2  }
   0x9   :  { %388 = vset.pattern.permute.xlu0 %v433_v6  ;;  %383 = vset.pattern.permute.xlu1 %v431_v3 }
   0xa   :  { %14 = vsyncpa [#allocation4], 0  ;;  %71 = vperm.xlu1 %383, %v32_v2   ;;  %95 = vperm.xlu0 %388, %v31_v5   ;;  %v30_v7 = vld [vmem:[%s558_s1] sm:$0xff]  ;;  %v120_v8 = vld [vmem:[%s559_s2 + $0x10] sm:$0xff]  ;;  %vm178_vm0 = vcmask 261120   ;;  %v54_v27 = vlaneseq }
   0xb   :  { %v154_v9 = vld [vmem:[%s561_s4] sm:$0xff]  ;;  %v156_v10 = vld [vmem:[%s561_s4 + $0x10] sm:$0xff]  ;;  %v121_v11 = vld [vmem:[%s559_s2 + $0x18] sm:$0xff] }
   0xc   :  { %v280_v12 = vld [vmem:[%s562_s5] sm:$0xff]  ;;  %v282_v13 = vld [vmem:[%s562_s5 + $0x10] sm:$0xff]  ;;  %v119_v14 = vld [vmem:[%s559_s2 + $0x8] sm:$0xff]  ;;  %v534_v29 = vshrl.u32 %v54_v27, 7 }
   0xd   :  { %v317_v15 = vld [vmem:[#allocation2] sm:$0x1]  ;;  %v155_v17 = vld [vmem:[%s561_s4 + $0x8] sm:$0xff]  ;;  %v157_v18 = vld [vmem:[%s561_s4 + $0x18] sm:$0xff] }
   0xe   :  { %384 = vset.pattern.permute.xlu1 %v433_v6  ;;  %389 = vset.pattern.permute.xlu0 %v432_v4  ;;  %v118_v16 = vld [vmem:[%s559_s2] sm:$0xff]  ;;  %v281_v19 = vld [vmem:[%s562_s5 + $0x8] sm:$0xff]  ;;  %v152_v21 = vld [vmem:[%s560_s3 + $0x10] sm:$0xff]  ;;  %v80_v31 = vsub.s32 1, %v534_v29  ;;  %v56_v32 = vsub.s32 0, %v534_v29  ;;  %v108_v36 = vsub.s32 2, %v534_v29 }
   0xf   :  { %103 = vperm.xlu1 %384, %v33_v1   ;;  %51 = vperm.xlu0 %389, %v33_v1   ;;  %v150_v20 = vld [vmem:[%s560_s3] sm:$0xff]  ;;  %v283_v22 = vld [vmem:[%s562_s5 + $0x18] sm:$0xff] }
  0x10   :  { %363 = vmatprep.mubr.msk.f32.mxu0 %vm178_vm0, %v150_v20  ;;  %366 = vmatprep.mubr.msk.f32.mxu1 %vm178_vm0, %v152_v21  ;;  %v29_v34 = vld [vmem:[%s557_s0] sm:$0x7] }
  0x11   :  { %v81_v35 = vrot.slane %v29_v34, %v80_v31  ;;  %v57_v38 = vrot.slane %v29_v34, %v56_v32  ;;  %v109_v42 = vrot.slane %v29_v34, %v108_v36 }
  0x13   :  { %385 = vset.pattern.permute.xlu1 %v431_v3  ;;  %41 = vperm.xlu0 %389, %v31_v5  }
  0x14   :  { %67 = vperm.xlu1 %385, %v31_v5  }
  0x17   :  { %36 = vperm.xlu0 %389, %v30_v7  }
  0x18   :  { %386 = vset.pattern.permute.xlu1 %v433_v6 }
  0x19   :  { %99 = vperm.xlu1 %386, %v32_v2  }
  0x1b   :  { %134 = vperm.xlu0 %389, %v120_v8  }
  0x1d   :  { %387 = vset.pattern.permute.xlu1 %v431_v3 }
  0x1e   :  { %63 = vperm.xlu1 %387, %v30_v7  }
  0x1f   :  { %160 = vperm.xlu0 %389, %v154_v9  }
  0x22   :  { %390 = vset.pattern.permute.xlu1 %v432_v4 }
  0x23   :  { %170 = vperm.xlu0 %389, %v156_v10   ;;  %139 = vperm.xlu1 %390, %v121_v11  }
  0x27   :  { %286 = vperm.xlu0 %389, %v280_v12   ;;  %391 = vset.pattern.permute.xlu1 %v433_v6  ;;  %v151_v12 = vld [vmem:[%s560_s3 + $0x8] sm:$0xff] }
  0x28   :  { %91 = vperm.xlu1 %391, %v30_v7  }
  0x2b   :  { %296 = vperm.xlu0 %389, %v282_v13   ;;  %v153_v13 = vld [vmem:[%s560_s3 + $0x18] sm:$0xff]  ;;  %s434_s3 = smov [#allocation3]  }
  0x2c   :  { %392 = vset.pattern.permute.xlu1 %v432_v4  ;;  %s335_s15 = sshll.u32 %s434_s3, 4  ;;  %s336_s15 = int_to_ptr.vmem [resolvable:$true] %s335_s15 }
  0x2d   :  { %129 = vperm.xlu1 %392, %v119_v14   ;;  %s409_s1 = scalar_lea.vmem %s336_s15, 16  ;;  %s413_s16 = scalar_lea.vmem %s336_s15, 32 }
  0x2e   :  { %p410_p0 = scmp.ne.s32.totalorder %s336_s15, %s409_s1  ;;  %p414_p1 = scmp.lt.s32.totalorder %s336_s15, %s336_s15 }
  0x2f   :  { %320 = vperm.xlu0 %389, %v317_v15   ;;  %p415_p2 = scmp.lt.s32.totalorder %s413_s16, %s409_s1 }
  0x31   :  { %124 = vperm.xlu1 %392, %v118_v16   ;;  %p416_p3 = por %p415_p2, %p414_p1 }
  0x33   :  { %p417_p4 = pnand %p416_p3, %p410_p0 }
  0x35   :  { %165 = vperm.xlu1 %392, %v155_v17  }
  0x39   :  { %175 = vperm.xlu1 %392, %v157_v18  }
  0x3d   :  { %291 = vperm.xlu1 %392, %v281_v19  }
  0x41   :  { %301 = vperm.xlu1 %392, %v283_v22  }
  0x80   :  { %v47_v23 = vpop.permute.xlu1 %46  ;;  %v76_v24 = vpop.permute.xlu0 %75 }
  0x81   :  { %v85_v40 = vmul.f32 %v81_v35, %v76_v24  ;;  %v60_v44 = vmul.f32 %v57_v38, %v47_v23 }
  0x85   :  { %v72_v25 = vpop.permute.xlu1 %71  ;;  %v96_v26 = vpop.permute.xlu0 %95 }
  0x86   :  { %v84_v41 = vmul.f32 %v81_v35, %v72_v25  ;;  %v111_v59 = vmul.f32 %v109_v42, %v96_v26 }
  0x88   :  { %v88_v47 = vadd.f32 %v84_v41, %v60_v44 }
  0x8a   :  { %v104_v28 = vpop.permute.xlu1 %103  ;;  %v52_v30 = vpop.permute.xlu0 %51 }
  0x8b   :  { %v61_v43 = vmul.f32 %v57_v38, %v52_v30  ;;  %v113_v50 = vmul.f32 %v109_v42, %v104_v28 }
  0x8d   :  { %v89_v48 = vadd.f32 %v85_v40, %v61_v43 }
  0x8e   :  { %v42_v37 = vpop.permute.xlu0 %41 }
  0x8f   :  { %v68_v33 = vpop.permute.xlu1 %67  ;;  %v117_v52 = vadd.f32 %v113_v50, %v89_v48  ;;  %v59_v55 = vmul.f32 %v57_v38, %v42_v37 }
  0x90   :  { %v83_v56 = vmul.f32 %v81_v35, %v68_v33 }
  0x92   :  { %v37_v46 = vpop.permute.xlu0 %36  ;;  %v87_v60 = vadd.f32 %v83_v56, %v59_v55 }
  0x93   :  { %v58_v62 = vmul.f32 %v57_v38, %v37_v46 }
  0x94   :  { %v100_v39 = vpop.permute.xlu1 %99  ;;  %v115_v1 = vadd.f32 %v111_v59, %v87_v60 }
  0x95   :  { %v112_v45 = vmul.f32 %v109_v42, %v100_v39 }
  0x96   :  { %v135_v53 = vpop.permute.xlu0 %134 }
  0x97   :  { %v116_v51 = vadd.f32 %v112_v45, %v88_v47 }
  0x99   :  { %v64_v49 = vpop.permute.xlu1 %63  ;;  %v144_v57 = vadd.f32 %v135_v53, %v116_v51 }
  0x9a   :  { %v82_v63 = vmul.f32 %v81_v35, %v64_v49  ;;  %v161_v14 = vpop.permute.xlu0 %160 }
  0x9c   :  { %v86_v3 = vadd.f32 %v82_v63, %v58_v62 }
  0x9e   :  { %v140_v54 = vpop.permute.xlu1 %139  ;;  %v171_v18 = vpop.permute.xlu0 %170 }
  0x9f   :  { %v145_v58 = vadd.f32 %v140_v54, %v117_v52 }
  0xa1   :  { %393 = vtanh.f32 %v145_v58 }
  0xa2   :  { %395 = vtanh.f32 %v144_v57  ;;  %v287_v26 = vpop.permute.xlu0 %286 }
  0xa3   :  { %v92_v61 = vpop.permute.xlu1 %91 }
  0xa4   :  { %v110_v0 = vmul.f32 %v109_v42, %v92_v61 }
  0xa6   :  { %v114_v5 = vadd.f32 %v110_v0, %v86_v3  ;;  %v297_v36 = vpop.permute.xlu0 %296 }
  0xa8   :  { %v130_v2 = vpop.permute.xlu1 %129 }
  0xa9   :  { %v143_v4 = vadd.f32 %v130_v2, %v115_v1 }
  0xaa   :  { %v321_v47 = vpop.permute.xlu0 %320 }
  0xab   :  { %397 = vtanh.f32 %v143_v4  ;;  %v326_v49 = vrot.slane %v321_v47, %v56_v32 }
  0xac   :  { %v125_v6 = vpop.permute.xlu1 %124 }
  0xad   :  { %v142_v7 = vadd.f32 %v125_v6, %v114_v5 }
  0xae   :  { %v394_v8 = vpop.eup %393 }
  0xaf   :  { %399 = vtanh.f32 %v142_v7  ;;  %355 = vmatprep.subr.mxu0 %v394_v8  ;;  %369 = vmatprep.subr.mxu1 %v394_v8  ;;  %v396_v9 = vpop.eup %395 }
  0xb0   :  { %356 = vmatpush3.msra.mxu0 %v394_v8  ;;  %373 = vmatpush3.msra.mxu1 %v394_v8  ;;  %v166_v15 = vpop.permute.xlu1 %165 }
  0xb1   :  { %357 = vmatprep.subr.mxu0 %v396_v9  ;;  %370 = vmatprep.subr.mxu1 %v396_v9 }
  0xb2   :  { %358 = vmatpush3.msra.mxu0 %v396_v9  ;;  %374 = vmatpush3.msra.mxu1 %v396_v9 }
  0xb4   :  { %v176_v19 = vpop.permute.xlu1 %175 }
  0xb8   :  { %v398_v10 = vpop.eup %397  ;;  %v292_v28 = vpop.permute.xlu1 %291 }
  0xb9   :  { %359 = vmatprep.subr.mxu0 %v398_v10  ;;  %371 = vmatprep.subr.mxu1 %v398_v10 }
  0xba   :  { %360 = vmatpush3.msra.mxu0 %v398_v10  ;;  %375 = vmatpush3.msra.mxu1 %v398_v10 }
  0xbc   :  { %v400_v11 = vpop.eup %399  ;;  %v302_v39 = vpop.permute.xlu1 %301 }
  0xbd   :  { %361 = vmatprep.subr.mxu0 %v400_v11  ;;  %372 = vmatprep.subr.mxu1 %v400_v11 }
  0xbe   :  { %362 = vmatpush3.msra.mxu0 %v400_v11  ;;  %376 = vmatpush3.msra.mxu1 %v400_v11 }
  0xbf   :  { %364 = vmatmul.mubr.msk.f32.vlgmr.msra.gmra.mxu0 %vm178_vm0, %v151_v12  ;;  %367 = vmatmul.mubr.msk.f32.vlgmr.msra.gmra.mxu1 %vm178_vm0, %v153_v13 }
 0x17f   :  { %v365_v16 = vpop.f32.mrf.mxu0  ;;  %v368_v17 = vpop.f32.mrf.mxu1 }
 0x180   :  { %v263_v20 = vadd.f32 %v365_v16, %v166_v15  ;;  %v273_v23 = vadd.f32 %v368_v17, %v176_v19 }
 0x181   :  { %v257_v21 = vpop.f32.mrf.mxu0  ;;  %v267_v22 = vpop.f32.mrf.mxu1 }
 0x182   :  { %401 = vtanh.f32 %v263_v20  ;;  %v258_v24 = vadd.f32 %v257_v21, %v161_v14  ;;  %v268_v25 = vadd.f32 %v267_v22, %v171_v18 }
 0x184   :  { %403 = vtanh.f32 %v258_v24 }
 0x185   :  { %405 = vtanh.f32 %v268_v25 }
 0x186   :  { %407 = vtanh.f32 %v273_v23 }
 0x18f   :  { %v402_v27 = vpop.eup %401 }
 0x190   :  { %v305_v33 = vmul.f32 %v402_v27, %v292_v28 }
 0x191   :  { %v404_v30 = vpop.eup %403 }
 0x192   :  { %v406_v31 = vpop.eup %405  ;;  %v304_v34 = vmul.f32 %v404_v30, %v287_v26 }
 0x193   :  { %v408_v35 = vpop.eup %407  ;;  %v306_v37 = vmul.f32 %v406_v31, %v297_v36 }
 0x194   :  { %v308_v38 = vadd.f32 %v305_v33, %v304_v34  ;;  %v307_v40 = vmul.f32 %v408_v35, %v302_v39 }
 0x196   :  { %v309_v41 = vadd.f32 %v308_v38, %v306_v37 }
 0x198   :  { %v310_v42 = vadd.f32 %v309_v41, %v307_v40 }
 0x19a   :  { %v311_v43 = vrot.slane %v310_v42, 4 }
 0x19c   :  { %v312_v44 = vadd.f32 %v311_v43, %v310_v42 }
 0x19e   :  { %v313_v45 = vrot.slane %v312_v44, 2 }
 0x1a0   :  { %v314_v46 = vadd.f32 %v313_v45, %v312_v44 }
 0x1a2   :  { %v315_v48 = vrot.slane %v314_v46, 1 }
 0x1a4   :  { %v316_v50 = vadd.f32 %v315_v48, %v314_v46 }
 0x1a6   :  { %v327_v51 = vadd.f32 %v326_v49, %v316_v50 }
 0x1a8   :  { %328 = vst [vmem:[#allocation3] sm:$0x1] %v327_v51 }
 0x1a9   :  { %420 = shalt.err (!%p417_p4)
}
 0x1aa   :  { %338 = dma.vmem_to_hbm [thread:$0]  %s336_s15, 16, %s564_s7, [#allocation4]  }
 0x1ab   :  { %429 = dma.done.wait [#allocation4], 16  }
 0x1ac   :  { %430 = vsyncadd [#allocation4], 4294967280 }
 0x1ad   :  { %342 = vsyncpa [#allocation4], 1 }

</bundles_post_ra>
